<compile_context>
chip_gen: v7x
topology: tpu7x:2x2x1
jax: 0.10.0
libtpu: 0.0.40
codegen_flags: <defaults>
</compile_context>

<pallas_src>
import jax
import jax.numpy as jnp
from jax.experimental import pallas as pl
from jax.experimental.pallas import tpu as pltpu


def _gcn_fused_kernel(x_ref, g_ref, shift_ref, o_ref):
    # x_ref:     (Bt, J*Cin)     bf16   activation tile (lane-dense)
    # g_ref:     (J*Cin, J*Cout) bf16   fused weight (adj + BN folded), resident across steps
    # shift_ref: (1, J*Cout)     f32    per-channel shift tiled over nodes
    # o_ref:     (Bt, J*Cout)    f32    lane-dense output tile
    y = jnp.dot(x_ref[...], g_ref[...], preferred_element_type=jnp.float32)
    o_ref[...] = jnp.maximum(y + shift_ref[...], 0.0).astype(o_ref.dtype)


def graph_conv_forward(x, adj, w, bias, gamma, beta, running_mean, running_var,
                       *, eps=1e-5, block_b=256):
    """Fused vanilla-GCN layer + inference BatchNorm + ReLU.  x: (B, J, Cin) -> (B, J, Cout)."""
    B, J, Cin = x.shape
    Cout = w.shape[1]

    # ---- fold BN (inference) and bias into the weight / a single per-channel shift ----
    scale = gamma * jax.lax.rsqrt(running_var + eps)                # (Cout,)
    w_fold = w * scale[None, :]                                     # (Cin, Cout)
    shift = (bias - running_mean) * scale + beta                    # (Cout,)

    # ---- fold adjacency: G[j*Cin+k, i*Cout+c] = adj[i, j] * w_fold[k, c] ----
    g = jnp.kron(adj.T, w_fold).astype(jnp.bfloat16)                # (J*Cin, J*Cout)
    shift_flat = jnp.tile(shift, J).reshape(1, J * Cout).astype(jnp.float32)

    # ---- lane-dense activation slab, bf16 for the MXU ----
    x_flat = x.reshape(B, J * Cin).astype(jnp.bfloat16)             # (B, J*Cin)

    # ---- batch tiling: Bt rows per grid step (multiple of 8 sublanes), pad B if needed ----
    if B <= block_b:
        bt, b_pad = B, B
    else:
        bt = max(8, (block_b // 8) * 8)
        b_pad = ((B + bt - 1) // bt) * bt
    if b_pad != B:
        x_flat = jnp.pad(x_flat, ((0, b_pad - B), (0, 0)))
    grid = (b_pad // bt,)

    kin, kout = J * Cin, J * Cout
    cost = pl.CostEstimate(
        flops=2 * b_pad * kin * kout,
        transcendentals=0,
        bytes_accessed=b_pad * kin * 2 + kin * kout * 2 + kout * 4 + b_pad * kout * 4,
    )

    out = pl.pallas_call(
        _gcn_fused_kernel,
        out_shape=jax.ShapeDtypeStruct((b_pad, kout), jnp.float32),
        grid=grid,
        in_specs=[
            pl.BlockSpec((bt, kin), lambda b: (b, 0)),      # x tile, lane-dense
            pl.BlockSpec((kin, kout), lambda b: (0, 0)),    # fused weight, block-invariant
            pl.BlockSpec((1, kout), lambda b: (0, 0)),      # shift, block-invariant
        ],
        out_specs=pl.BlockSpec((bt, kout), lambda b: (b, 0)),
        compiler_params=pltpu.CompilerParams(
            dimension_semantics=("parallel",),              # shards grid steps across TCs (v7x)
            vmem_limit_bytes=32 * 1024 * 1024,              # actual use ~few MiB; fits v7x 64 MiB
        ),
        cost_estimate=cost,
    )(x_flat, g, shift_flat)

    return out[:B].reshape(B, J, Cout)


def _reference(x, adj, w, bias, gamma, beta, mean, var, eps=1e-5):
    xw = jnp.einsum("bjk,kc->bjc", x, w, precision=jax.lax.Precision.HIGHEST)
    y = jnp.einsum("ij,bjc->bic", adj, xw, precision=jax.lax.Precision.HIGHEST) + bias
    y = (y - mean) * jax.lax.rsqrt(var + eps) * gamma + beta
    return jnp.maximum(y, 0.0)


def _normalized_adjacency(J):
    # simple chain graph with self loops, symmetric normalization D^-1/2 (A+I) D^-1/2
    a = jnp.eye(J)
    idx = jnp.arange(J - 1)
    a = a.at[idx, idx + 1].set(1.0).at[idx + 1, idx].set(1.0)
    d = jnp.sum(a, axis=1)
    dinv = 1.0 / jnp.sqrt(d)
    return a * dinv[:, None] * dinv[None, :]


if __name__ == "__main__":
    # Small hidden GCN layer; block_b=32 -> grid of 2 parallel batch tiles.
    B, J, Cin, Cout = 64, 16, 32, 32

    key = jax.random.PRNGKey(0)
    kx, kw, kb, kg, kbe, km, kv = jax.random.split(key, 7)

    x = jax.random.normal(kx, (B, J, Cin), dtype=jnp.float32)
    adj = _normalized_adjacency(J).astype(jnp.float32)

    # deterministic synthetic parameters (shapes per module __init__)
    w = jax.random.normal(kw, (Cin, Cout), dtype=jnp.float32) * (1.0 / jnp.sqrt(Cin))
    bias = 0.1 * jax.random.normal(kb, (Cout,), dtype=jnp.float32)
    gamma = 1.0 + 0.1 * jax.random.normal(kg, (Cout,), dtype=jnp.float32)
    beta = 0.1 * jax.random.normal(kbe, (Cout,), dtype=jnp.float32)
    running_mean = 0.1 * jax.random.normal(km, (Cout,), dtype=jnp.float32)
    running_var = jnp.abs(1.0 + 0.1 * jax.random.normal(kv, (Cout,), dtype=jnp.float32))

    out = graph_conv_forward(x, adj, w, bias, gamma, beta, running_mean, running_var,
                             block_b=32)
    out = jax.block_until_ready(out)

    ref = _reference(x, adj, w, bias, gamma, beta, running_mean, running_var)
    assert out.shape == (B, J, Cout)
    # bf16 MXU inputs (f32 accumulation) -> loosened tolerance vs the pure-f32 reference.
    assert jnp.allclose(out, ref, atol=5e-2, rtol=5e-2), "mismatch vs reference"

    print("KERNEL_OK")
</pallas_src>

<mosaic_0001>
module attributes {stable_mosaic.version = 11 : i64} {
  func.func @_gcn_fused_kernel(%arg0: i32, %arg1: memref<32x512xbf16, #tpu.memory_space<vmem>>, %arg2: memref<512x512xbf16, #tpu.memory_space<vmem>>, %arg3: memref<1x512xf32, #tpu.memory_space<vmem>>, %arg4: memref<32x512xf32, #tpu.memory_space<vmem>>) attributes {dimension_semantics = [#tpu.dimension_semantics<parallel>], iteration_bounds = array<i64: 2>, scalar_prefetch = 0 : i64, scratch_operands = 0 : i64, tpu.core_type = #tpu.core_type<tc>, window_params = [{transform_indices = @transform_0, window_bounds = array<i64: 32, 512>}, {pipeline_mode = #tpu.pipeline_mode<synchronous>, transform_indices = @transform_1, window_bounds = array<i64: 512, 512>}, {pipeline_mode = #tpu.pipeline_mode<synchronous>, transform_indices = @transform_2, window_bounds = array<i64: 1, 512>}, {transform_indices = @transform_3, window_bounds = array<i64: 32, 512>}]} {
    %c0 = arith.constant 0 : index
    %c0_0 = arith.constant 0 : index
    %0 = vector.load %arg1[%c0, %c0_0] : memref<32x512xbf16, #tpu.memory_space<vmem>>, vector<32x512xbf16>
    %c0_1 = arith.constant 0 : index
    %c0_2 = arith.constant 0 : index
    %1 = vector.load %arg2[%c0_1, %c0_2] : memref<512x512xbf16, #tpu.memory_space<vmem>>, vector<512x512xbf16>
    %cst = arith.constant dense<0.000000e+00> : vector<32x512xf32>
    %2 = tpu.matmul %0, %1, %cst {dimension_numbers = #tpu.dot_dimension_numbers<[1], [0], [0], [1], [0, 0, 1, 1], [], []>} : vector<32x512xbf16>, vector<512x512xbf16>, vector<32x512xf32> -> vector<32x512xf32>
    %c0_3 = arith.constant 0 : index
    %c0_4 = arith.constant 0 : index
    %3 = vector.load %arg3[%c0_3, %c0_4] : memref<1x512xf32, #tpu.memory_space<vmem>>, vector<1x512xf32>
    %4 = vector.broadcast %3 : vector<1x512xf32> to vector<32x512xf32>
    %5 = arith.addf %2, %4 : vector<32x512xf32>
    %cst_5 = arith.constant 0.000000e+00 : f32
    %6 = vector.broadcast %cst_5 : f32 to vector<32x512xf32>
    %7 = arith.maximumf %5, %6 : vector<32x512xf32>
    %c0_6 = arith.constant 0 : index
    %c0_7 = arith.constant 0 : index
    %8 = vector.load %arg4[%c0_6, %c0_7] : memref<32x512xf32, #tpu.memory_space<vmem>>, vector<32x512xf32>
    tpu.vector_store %arg4[%c0_6, %c0_7], %7 {strides = array<i32>} : memref<32x512xf32, #tpu.memory_space<vmem>>, vector<32x512xf32>,
    return
  }
  func.func @transform_0(%arg0: i32) -> (i32, i32) {
    %c0_i32 = arith.constant 0 : i32
    %c0_i32_0 = arith.constant 0 : i32
    return %arg0, %c0_i32 : i32, i32
  }
  func.func @transform_1(%arg0: i32) -> (i32, i32) {
    %c0_i32 = arith.constant 0 : i32
    %c0_i32_0 = arith.constant 0 : i32
    %c0_i32_1 = arith.constant 0 : i32
    return %c0_i32, %c0_i32_0 : i32, i32
  }
  func.func @transform_2(%arg0: i32) -> (i32, i32) {
    %c0_i32 = arith.constant 0 : i32
    %c0_i32_0 = arith.constant 0 : i32
    %c0_i32_1 = arith.constant 0 : i32
    return %c0_i32, %c0_i32_0 : i32, i32
  }
  func.func @transform_3(%arg0: i32) -> (i32, i32) {
    %c0_i32 = arith.constant 0 : i32
    %c0_i32_0 = arith.constant 0 : i32
    return %arg0, %c0_i32 : i32, i32
  }
}

</mosaic_0001>

<bundles_post_ra>
// kernel: tpu_custom_call.1
= control target key start
LH: loop header
LB: loop body
LE: loop exit
PB: predicated region body
PF: predicated region fallthrough
CT: control target
= control target key end

     0   :  { %8 = vsyncpa [#allocation3], 0  ;;  %s2239_s0 = inlined_call_operand.hbm [shape: bf16[64,512], index: 0, kind: input, shape index: {}]   ;;  %s2240_s1 = inlined_call_operand.hbm [shape: bf16[512,512], index: 1, kind: input, shape index: {}]   ;;  %s2241_s2 = inlined_call_operand.vmem [shape: f32[1,512], index: 2, kind: input, shape index: {}]   ;;  %s2242_s3 = inlined_call_operand.hbm [shape: f32[64,512], index: 3, kind: output, shape index: {}]  }
   0x1   :  { %10 = vsyncpa [#allocation3 + $0x1], 0 }
   0x2   :  { %11 = vsyncpa [#allocation6], 0 }
   0x3   :  { %12 = vsyncpa [#allocation4], 0 }
   0x4   :  { %14 = vsyncpa [#allocation4 + $0x1], 0  ;;  %s1999_s12 = smov 0   ;;  %s2001_s13 = smov 0  }
   0x5   :  { %s2003_s14 = smov 0   ;;  %s2005_s15 = smov 0  }
   0x6 LB: > { %s2020_s16 = sadd.s32 4294967295, %s1970_s15   ;;  %s1387_s17 = sadd.s32 4294967294, %s1970_s15   ;;  %s1970_s15 = sphi %s2005_s15, %s2262_s15   ;;  %s1966_s14 = sphi %s2003_s14, %s2261_s14   ;;  %s1962_s13 = sphi %s2001_s13, %s2260_s13   ;;  %s1958_s12 = sphi %s1999_s12, %s2259_s12  }
   0x7   : > { %p40_p0 = scmp.ne.s32.totalorder %s1962_s13, %s1958_s12  ;;  %p2243_p1 = scmp.eq.s32.totalorder %s2020_s16, 0 }
   0x8   : > { %p112_p3 = scmp.eq.s32.totalorder %s1387_s17, 1  ;;  %p1388_p5 = scmp.ge.s32.totalorder %s1970_s15, 1 }
   0x9   : > { %p2029_p4 = por %p2243_p1, %p40_p0  ;;  %p119_p7 = scmp.lt.s32.totalorder %s1970_s15, 3 }
   0xa   : > { %p2034_p6 = por %p112_p3, %p40_p0  ;;  %s1972_s21 = smov [#allocation5]  }
   0xb   : > { %s2246_s18 = scalar_select %p2029_p4, 1, 0 }
   0xc   : > { %s2247_s19 = scalar_select %p2034_p6, 1, 0 }
   0xd   : > { %p2039_p8 = pnand %p1388_p5, %p119_p7  ;;  %s131_s22 = sshll.u32 %s1972_s21, 4  ;;  %s2043_s22 = int_to_ptr.vmem [resolvable:$true] %s131_s22 }
   0xe   : > { %s2055_s24 = sadd.s32 1, %s1970_s15   ;;  %s27_s25 = sadd.s32 1, %s1966_s14 }
   0xf   : > { %s2248_s20 = scalar_select %p2039_p8, 1, 0 }
  0x10   : > { %p1585_p9 = pneg %p2039_p8  ;;  %s24_s26 = ssub.s32 %s1970_s15, %s2055_s24 }
  0x11   : > { %s1842_s29 = scalar_lea.hbm %s2240_s1, 16384 }
  0x12   : > { %p2050_p11 = pnand %p1585_p9, %p2243_p1  ;;  %p1843_p12 = scmp.ne.s32.totalorder %s2240_s1, %s1842_s29 }
  0x13   : > { %p1849_p5 = scmp.lt.u32.totalorder %s1842_s29, %s2240_s1 }
  0x14   : > { %p1844_p13 = pneg %p2050_p11 }
  0x16   : > { %p1845_p0 = pnand %p1844_p13, %p1843_p12 }
  0x18   : > { %p1846_p3 = pneg %p1845_p0 }
  0x1a   : > { %p1851_p7 = pnand %p1849_p5, %p1846_p3 }
  0x1c   : > { %1854 = shalt.err (!%p1851_p7)
}
  0x1d   : > { %s1855_s7 = scalar_lea.vmem %s2043_s22, 16384  ;;  %p1863_p2 = scmp.lt.s32.totalorder %s2043_s22, %s2043_s22 }
  0x1e   : > { %p1856_p9 = scmp.ne.s32.totalorder %s2043_s22, %s1855_s7  ;;  %p1864_p6 = scmp.lt.s32.totalorder %s1855_s7, %s1855_s7 }
  0x20   : > { %p1858_p10 = pnand %p1856_p9, %p1844_p13  ;;  %p1865_p4 = por %p1864_p6, %p1863_p2 }
  0x22   : > { %p1859_p1 = pneg %p1858_p10 }
  0x24   : > { %p1866_p8 = pnand %p1865_p4, %p1859_p1 }
  0x26   : > { %1869 = shalt.err (!%p1866_p8)
}
  0x27   : > { %s1973_s8 = smov 256   ;;  %s1974_s9 = smov 16  }
  0x28   : > { %1588 = dma.hbm_to_vmem [thread:$0]  (!%p2050_p11), %s2240_s1, 16384, %s2043_s22, [#allocation6], %s1973_s8, %s1973_s8, %s1974_s9  }
  0x29   : > { %p25_p1 = scmp.eq.s32.totalorder %s24_s26, 0  ;;  %p34_p2 = scmp.ne.s32.totalorder %s1966_s14, %s1962_s13 }
  0x2a   : > { %p35_p4 = scmp.eq.s32.totalorder %s1970_s15, 0  ;;  %p1598_p6 = scmp.lt.s32.totalorder %s1970_s15, 2 }
  0x2b   : > { %s2089_s17 = scalar_select %p25_p1, %s1966_s14, %s27_s25  }
  0x2c   : > { %p36_p8 = por %p35_p4, %p34_p2  ;;  %p2250_p10 = scmp.eq.s32.totalorder %s2020_s16, 1 }
  0x2d   : > { %s148_s23 = sand.u32 1, %s1966_s14   ;;  %s1542_s27 = sshll.u32 %s1970_s15, 10 }
  0x2e   : > { %p2093_p12 = por %p2250_p10, %p34_p2  ;;  %s1391_s28 = sshll.u32 %s148_s23, 6 }
  0x2f   : > { %s2102_s4 = scalar_lea.hbm %s2239_s0, %s1542_s27  ;;  %s152_s22 = scalar_lea.vmem [#allocation2], %s1391_s28 }
  0x30   : > { %s160_s25 = sshll.u32 %s152_s22, 4  ;;  %p2104_p11 = pnand %p1598_p6, %p36_p8  ;;  %s2108_s25 = int_to_ptr.vmem [resolvable:$true] %s160_s25 }
  0x31   : > { %s2110_s5 = scalar_lea.sflag [#allocation3], %s148_s23  ;;  %s1870_s6 = scalar_lea.hbm %s2102_s4, 1024 }
  0x32   : > { %p1871_p13 = scmp.ne.s32.totalorder %s2102_s4, %s1870_s6  ;;  %p1872_p0 = pneg %p2104_p11 }
  0x33   : > { %s1875_s11 = scalar_lea.hbm %s2239_s0, 2048  ;;  %p1876_p7 = scmp.lt.u32.totalorder %s2102_s4, %s2239_s0 }
  0x34   : > { %p1873_p3 = pnand %p1872_p0, %p1871_p13  ;;  %p1877_p9 = scmp.lt.u32.totalorder %s1875_s11, %s1870_s6 }
  0x35   : > { %p1879_p2 = scmp.lt.u32.totalorder %s1870_s6, %s2102_s4 }
  0x36   : > { %p1874_p5 = pneg %p1873_p3  ;;  %p1878_p1 = por %p1877_p9, %p1876_p7 }
  0x38   : > { %p1880_p4 = por %p1879_p2, %p1878_p1 }
  0x3a   : > { %p1881_p6 = pnand %p1880_p4, %p1874_p5 }
  0x3c   : > { %1884 = shalt.err (!%p1881_p6)
}
  0x3d   : > { %s1885_s23 = scalar_lea.vmem %s2108_s25, 1024  ;;  %s1975_s29 = smov [#allocation2]  }
  0x3e   : > { %p1886_p8 = scmp.ne.s32.totalorder %s2108_s25, %s1885_s23  ;;  %s1890_s30 = sshll.u32 %s1975_s29, 4  ;;  %s1891_s30 = int_to_ptr.vmem [resolvable:$false] %s1890_s30 }
  0x3f   : > { %s1892_s22 = scalar_lea.vmem %s1891_s30, 2048  ;;  %p1893_p3 = scmp.lt.s32.totalorder %s2108_s25, %s1891_s30 }
  0x40   : > { %p1888_p10 = pnand %p1886_p8, %p1872_p0  ;;  %p1894_p7 = scmp.lt.s32.totalorder %s1892_s22, %s1885_s23 }
  0x42   : > { %p1889_p13 = pneg %p1888_p10  ;;  %p1895_p9 = por %p1894_p7, %p1893_p3 }
  0x44   : > { %p1896_p1 = pnand %p1895_p9, %p1889_p13 }
  0x46   : > { %1899 = shalt.err (!%p1896_p1)
}
  0x47   : > { %1592 = dma.hbm_to_vmem [thread:$0]  (!%p2104_p11), %s2102_s4, 1024, %s2108_s25, %s2110_s5, %s1973_s8, %s1973_s8, %s1974_s9  }
  0x48   : > { %p2253_p0 = scmp.ne.s32.totalorder %s2248_s20, 0 }
  0x49   : > { %s2144_s6 = sand.u32 (!%p2253_p0), 1, %s1962_s13   ;;  %p2254_p5 = scmp.ne.s32.totalorder (!%p2253_p0), %s2246_s18, 0 }
  0x4a   : > { %172 = sbr.rel (%p2253_p0) target bundleno = 456 (0x1c8), region = 32  ;;  %s1396_s7 = sshll.u32 (!%p2253_p0), %s2144_s6, 6 }
  0x4b   : > { %s175_s10 = scalar_lea.sflag (!%p2253_p0), [#allocation3], %s2144_s6  ;;  %s2148_s11 = scalar_lea.vmem (!%p2253_p0), [#allocation2], %s1396_s7 }
  0x51   : > { %1945 = dma.done.wait (%p2254_p5), %s175_s10, 1024  }
  0x52   : > { %1947 = vsyncadd (%p2254_p5), %s175_s10, 4294966272  ;;  %p2255_p11 = scmp.eq.s32.totalorder %s2020_s16, 0 }
  0x54   : > { %1949 = dma.done.wait (%p2255_p11), [#allocation6], 16384   ;;  %p2256_p2 = pmov %p2255_p11 }
  0x55   : > { %v1638_v0 = vld [vmem:[#allocation5 + $0x4] ss:$16 sps:$4 sm:$0xff]   ;;  %v1640_v1 = vld [vmem:[#allocation5 + $0xc] ss:$16 sps:$4 sm:$0xff]   ;;  %v1642_v2 = vld [vmem:[#allocation5] ss:$16 sps:$4 sm:$0xff]  }
  0x56   : > { %1951 = vsyncadd (%p2256_p2), [#allocation6], 4294950912  ;;  %1045 = vmatprep.subr.bf16.mxu0 %v1638_v0  ;;  %v1643_v3 = vld [vmem:[#allocation5 + $0x8] ss:$16 sps:$4 sm:$0xff]   ;;  %1151 = vmatprep.subr.bf16.mxu1 %v1640_v1  ;;  %v1644_v4 = vld [vmem:[#allocation5 + $0x24] ss:$16 sps:$4 sm:$0xff]  }
  0x57   : > { %1046 = vmatpush1.bf16.msra.mxu0 %v1642_v2  ;;  %1152 = vmatpush1.bf16.msra.mxu1 %v1643_v3  ;;  %v1646_v5 = vld [vmem:[#allocation5 + $0x2c] ss:$16 sps:$4 sm:$0xff]   ;;  %v1648_v6 = vld [vmem:[#allocation5 + $0x20] ss:$16 sps:$4 sm:$0xff]   ;;  %v1649_v7 = vld [vmem:[#allocation5 + $0x28] ss:$16 sps:$4 sm:$0xff]  }
  0x58   : > { %1047 = vmatprep.subr.bf16.mxu0 %v1644_v4  ;;  %1153 = vmatprep.subr.bf16.mxu1 %v1646_v5  ;;  %v1650_v8 = vld [vmem:[#allocation5 + $0x44] ss:$16 sps:$4 sm:$0xff]   ;;  %v1652_v9 = vld [vmem:[#allocation5 + $0x4c] ss:$16 sps:$4 sm:$0xff]   ;;  %v1654_v10 = vld [vmem:[#allocation5 + $0x40] ss:$16 sps:$4 sm:$0xff]  }
  0x59   : > { %v1655_v11 = vld [vmem:[#allocation5 + $0x48] ss:$16 sps:$4 sm:$0xff]   ;;  %v1656_v12 = vld [vmem:[#allocation5 + $0x64] ss:$16 sps:$4 sm:$0xff]   ;;  %v1658_v13 = vld [vmem:[#allocation5 + $0x6c] ss:$16 sps:$4 sm:$0xff]  }
  0x5a   : > { %v1660_v14 = vld [vmem:[#allocation5 + $0x60] ss:$16 sps:$4 sm:$0xff]   ;;  %v1661_v15 = vld [vmem:[#allocation5 + $0x68] ss:$16 sps:$4 sm:$0xff]   ;;  %v1662_v16 = vld [vmem:[#allocation5 + $0x84] ss:$16 sps:$4 sm:$0xff]  }
  0x5b   : > { %1048 = vmatpush1.bf16.msra.mxu0 %v1648_v6  ;;  %1154 = vmatpush1.bf16.msra.mxu1 %v1649_v7  ;;  %v1664_v17 = vld [vmem:[#allocation5 + $0x8c] ss:$16 sps:$4 sm:$0xff]   ;;  %v1666_v18 = vld [vmem:[#allocation5 + $0x80] ss:$16 sps:$4 sm:$0xff]   ;;  %v1667_v19 = vld [vmem:[#allocation5 + $0x88] ss:$16 sps:$4 sm:$0xff]  }
  0x5c   : > { %1049 = vmatprep.subr.bf16.mxu0 %v1650_v8  ;;  %1155 = vmatprep.subr.bf16.mxu1 %v1652_v9  ;;  %v1668_v20 = vld [vmem:[#allocation5 + $0xa4] ss:$16 sps:$4 sm:$0xff]   ;;  %v1670_v21 = vld [vmem:[#allocation5 + $0xac] ss:$16 sps:$4 sm:$0xff]   ;;  %v1672_v22 = vld [vmem:[#allocation5 + $0xa0] ss:$16 sps:$4 sm:$0xff]  }
  0x5d   : > { %v1673_v23 = vld [vmem:[#allocation5 + $0xa8] ss:$16 sps:$4 sm:$0xff]   ;;  %v1674_v24 = vld [vmem:[#allocation5 + $0xc4] ss:$16 sps:$4 sm:$0xff]   ;;  %v1676_v25 = vld [vmem:[#allocation5 + $0xcc] ss:$16 sps:$4 sm:$0xff]  }
  0x5e   : > { %v1678_v26 = vld [vmem:[#allocation5 + $0xc0] ss:$16 sps:$4 sm:$0xff]   ;;  %v1679_v27 = vld [vmem:[#allocation5 + $0xc8] ss:$16 sps:$4 sm:$0xff]   ;;  %v1680_v28 = vld [vmem:[#allocation5 + $0xe4] ss:$16 sps:$4 sm:$0xff]  }
  0x5f   : > { %1050 = vmatpush1.bf16.msra.mxu0 %v1654_v10  ;;  %1156 = vmatpush1.bf16.msra.mxu1 %v1655_v11  ;;  %v1682_v29 = vld [vmem:[#allocation5 + $0xec] ss:$16 sps:$4 sm:$0xff]   ;;  %v1684_v30 = vld [vmem:[#allocation5 + $0xe0] ss:$16 sps:$4 sm:$0xff]   ;;  %v1685_v31 = vld [vmem:[#allocation5 + $0xe8] ss:$16 sps:$4 sm:$0xff]  }
  0x60   : > { %1051 = vmatprep.subr.bf16.mxu0 %v1656_v12  ;;  %1157 = vmatprep.subr.bf16.mxu1 %v1658_v13  ;;  %v1686_v32 = vld [vmem:[#allocation5 + $0x104] ss:$16 sps:$4 sm:$0xff]   ;;  %v1688_v33 = vld [vmem:[#allocation5 + $0x10c] ss:$16 sps:$4 sm:$0xff]   ;;  %v1690_v34 = vld [vmem:[#allocation5 + $0x100] ss:$16 sps:$4 sm:$0xff]  }
  0x61   : > { %v1691_v35 = vld [vmem:[#allocation5 + $0x108] ss:$16 sps:$4 sm:$0xff]   ;;  %v1692_v36 = vld [vmem:[#allocation5 + $0x124] ss:$16 sps:$4 sm:$0xff]   ;;  %v1694_v37 = vld [vmem:[#allocation5 + $0x12c] ss:$16 sps:$4 sm:$0xff]  }
  0x62   : > { %v1696_v38 = vld [vmem:[#allocation5 + $0x120] ss:$16 sps:$4 sm:$0xff]   ;;  %v1697_v39 = vld [vmem:[#allocation5 + $0x128] ss:$16 sps:$4 sm:$0xff]   ;;  %v1698_v40 = vld [vmem:[#allocation5 + $0x144] ss:$16 sps:$4 sm:$0xff]  }
  0x63   : > { %1052 = vmatpush1.bf16.msra.mxu0 %v1660_v14  ;;  %1158 = vmatpush1.bf16.msra.mxu1 %v1661_v15  ;;  %v1700_v41 = vld [vmem:[#allocation5 + $0x14c] ss:$16 sps:$4 sm:$0xff]   ;;  %v1702_v42 = vld [vmem:[#allocation5 + $0x140] ss:$16 sps:$4 sm:$0xff]   ;;  %v1703_v43 = vld [vmem:[#allocation5 + $0x148] ss:$16 sps:$4 sm:$0xff]  }
  0x64   : > { %1053 = vmatprep.subr.bf16.mxu0 %v1662_v16  ;;  %1159 = vmatprep.subr.bf16.mxu1 %v1664_v17  ;;  %v1704_v44 = vld [vmem:[#allocation5 + $0x164] ss:$16 sps:$4 sm:$0xff]   ;;  %v1706_v45 = vld [vmem:[#allocation5 + $0x16c] ss:$16 sps:$4 sm:$0xff]   ;;  %v1708_v46 = vld [vmem:[#allocation5 + $0x160] ss:$16 sps:$4 sm:$0xff]  }
  0x65   : > { %v1709_v47 = vld [vmem:[#allocation5 + $0x168] ss:$16 sps:$4 sm:$0xff]   ;;  %v1736_v48 = vld [vmem:[%s2148_s11 + $0x4] ss:$16 sps:$4 sm:$0xff]   ;;  %v1712_v50 = vld [vmem:[#allocation5 + $0x18c] ss:$16 sps:$4 sm:$0xff]  }
  0x66   : > { %v1710_v49 = vld [vmem:[#allocation5 + $0x184] ss:$16 sps:$4 sm:$0xff]   ;;  %1077 = vmatprep.mubr.bf16.mxu0 %v1736_v48  ;;  %1183 = vmatprep.mubr.bf16.mxu1 %v1736_v48  ;;  %v1714_v51 = vld [vmem:[#allocation5 + $0x180] ss:$16 sps:$4 sm:$0xff]   ;;  %v1715_v52 = vld [vmem:[#allocation5 + $0x188] ss:$16 sps:$4 sm:$0xff]  }
  0x67   : > { %1054 = vmatpush1.bf16.msra.mxu0 %v1666_v18  ;;  %1160 = vmatpush1.bf16.msra.mxu1 %v1667_v19  ;;  %v1716_v53 = vld [vmem:[#allocation5 + $0x1a4] ss:$16 sps:$4 sm:$0xff]   ;;  %v1718_v54 = vld [vmem:[#allocation5 + $0x1ac] ss:$16 sps:$4 sm:$0xff]   ;;  %v1720_v55 = vld [vmem:[#allocation5 + $0x1a0] ss:$16 sps:$4 sm:$0xff]  }
  0x68   : > { %1055 = vmatprep.subr.bf16.mxu0 %v1668_v20  ;;  %1161 = vmatprep.subr.bf16.mxu1 %v1670_v21  ;;  %v1721_v56 = vld [vmem:[#allocation5 + $0x1a8] ss:$16 sps:$4 sm:$0xff]   ;;  %v1722_v57 = vld [vmem:[#allocation5 + $0x1c4] ss:$16 sps:$4 sm:$0xff]   ;;  %v1724_v58 = vld [vmem:[#allocation5 + $0x1cc] ss:$16 sps:$4 sm:$0xff]  }
  0x69   : > { %v1726_v59 = vld [vmem:[#allocation5 + $0x1c0] ss:$16 sps:$4 sm:$0xff]   ;;  %v1727_v60 = vld [vmem:[#allocation5 + $0x1c8] ss:$16 sps:$4 sm:$0xff]   ;;  %v1728_v61 = vld [vmem:[#allocation5 + $0x1e4] ss:$16 sps:$4 sm:$0xff]  }
  0x6a   : > { %v1730_v62 = vld [vmem:[#allocation5 + $0x1ec] ss:$16 sps:$4 sm:$0xff]   ;;  %v1732_v63 = vld [vmem:[#allocation5 + $0x1e0] ss:$16 sps:$4 sm:$0xff]   ;;  %v1733_v0 = vld [vmem:[#allocation5 + $0x1e8] ss:$16 sps:$4 sm:$0xff]  }
  0x6b   : > { %1056 = vmatpush1.bf16.msra.mxu0 %v1672_v22  ;;  %1162 = vmatpush1.bf16.msra.mxu1 %v1673_v23  ;;  %v1739_v1 = vld [vmem:[#allocation5 + $0x204] ss:$16 sps:$4 sm:$0xff]   ;;  %v1742_v2 = vld [vmem:[#allocation5 + $0x20c] ss:$16 sps:$4 sm:$0xff]   ;;  %v1734_v3 = vld [vmem:[%s2148_s11] ss:$16 sps:$4 sm:$0xff]  }
  0x6c   : > { %1057 = vmatprep.subr.bf16.mxu0 %v1674_v24  ;;  %1163 = vmatprep.subr.bf16.mxu1 %v1676_v25  ;;  %v1737_v4 = vld [vmem:[#allocation5 + $0x200] ss:$16 sps:$4 sm:$0xff]   ;;  %v1740_v5 = vld [vmem:[#allocation5 + $0x208] ss:$16 sps:$4 sm:$0xff]   ;;  %v1745_v6 = vld [vmem:[#allocation5 + $0x224] ss:$16 sps:$4 sm:$0xff]  }
  0x6d   : > { %v1748_v7 = vld [vmem:[#allocation5 + $0x22c] ss:$16 sps:$4 sm:$0xff]   ;;  %v1743_v8 = vld [vmem:[#allocation5 + $0x220] ss:$16 sps:$4 sm:$0xff]   ;;  %v1746_v9 = vld [vmem:[#allocation5 + $0x228] ss:$16 sps:$4 sm:$0xff]  }
  0x6e   : > { %v1751_v10 = vld [vmem:[#allocation5 + $0x244] ss:$16 sps:$4 sm:$0xff]   ;;  %v1754_v11 = vld [vmem:[#allocation5 + $0x24c] ss:$16 sps:$4 sm:$0xff]   ;;  %v1749_v12 = vld [vmem:[#allocation5 + $0x240] ss:$16 sps:$4 sm:$0xff]  }
  0x6f   : > { %1058 = vmatpush1.bf16.msra.mxu0 %v1678_v26  ;;  %1164 = vmatpush1.bf16.msra.mxu1 %v1679_v27  ;;  %v1752_v13 = vld [vmem:[#allocation5 + $0x248] ss:$16 sps:$4 sm:$0xff]   ;;  %v1757_v14 = vld [vmem:[#allocation5 + $0x264] ss:$16 sps:$4 sm:$0xff]   ;;  %v1760_v15 = vld [vmem:[#allocation5 + $0x26c] ss:$16 sps:$4 sm:$0xff]  }
  0x70   : > { %1059 = vmatprep.subr.bf16.mxu0 %v1680_v28  ;;  %1165 = vmatprep.subr.bf16.mxu1 %v1682_v29  ;;  %v1755_v16 = vld [vmem:[#allocation5 + $0x260] ss:$16 sps:$4 sm:$0xff]   ;;  %v1758_v17 = vld [vmem:[#allocation5 + $0x268] ss:$16 sps:$4 sm:$0xff]   ;;  %v1763_v18 = vld [vmem:[#allocation5 + $0x284] ss:$16 sps:$4 sm:$0xff]  }
  0x71   : > { %v1766_v19 = vld [vmem:[#allocation5 + $0x28c] ss:$16 sps:$4 sm:$0xff]   ;;  %v1761_v20 = vld [vmem:[#allocation5 + $0x280] ss:$16 sps:$4 sm:$0xff]   ;;  %v1764_v21 = vld [vmem:[#allocation5 + $0x288] ss:$16 sps:$4 sm:$0xff]  }
  0x72   : > { %v1769_v22 = vld [vmem:[#allocation5 + $0x2a4] ss:$16 sps:$4 sm:$0xff]   ;;  %v1772_v23 = vld [vmem:[#allocation5 + $0x2ac] ss:$16 sps:$4 sm:$0xff]   ;;  %v1767_v24 = vld [vmem:[#allocation5 + $0x2a0] ss:$16 sps:$4 sm:$0xff]  }
  0x73   : > { %1060 = vmatpush1.bf16.msra.mxu0 %v1684_v30  ;;  %1166 = vmatpush1.bf16.msra.mxu1 %v1685_v31  ;;  %v1821_v25 = vld [vmem:[%s2148_s11 + $0x24] ss:$16 sps:$4 sm:$0xff]   ;;  %v1770_v26 = vld [vmem:[#allocation5 + $0x2a8] ss:$16 sps:$4 sm:$0xff]   ;;  %v1823_v27 = vld [vmem:[%s2148_s11 + $0x20] ss:$16 sps:$4 sm:$0xff]  }
  0x74   : > { %1061 = vmatprep.subr.bf16.mxu0 %v1686_v32  ;;  %1167 = vmatprep.subr.bf16.mxu1 %v1688_v33  ;;  %v1775_v28 = vld [vmem:[#allocation5 + $0x2c4] ss:$16 sps:$4 sm:$0xff]   ;;  %v1778_v29 = vld [vmem:[#allocation5 + $0x2cc] ss:$16 sps:$4 sm:$0xff]   ;;  %v1773_v30 = vld [vmem:[#allocation5 + $0x2c0] ss:$16 sps:$4 sm:$0xff]  }
  0x75   : > { %v1776_v31 = vld [vmem:[#allocation5 + $0x2c8] ss:$16 sps:$4 sm:$0xff]   ;;  %v1781_v32 = vld [vmem:[#allocation5 + $0x2e4] ss:$16 sps:$4 sm:$0xff]   ;;  %v1784_v33 = vld [vmem:[#allocation5 + $0x2ec] ss:$16 sps:$4 sm:$0xff]  }
  0x76   : > { %v1800_v48 = vld [vmem:[#allocation5 + $0x348] ss:$16 sps:$4 sm:$0xff]   ;;  %s1398_s8 = sshll.u32 %s2144_s6, 7  ;;  %s1544_s4 = sshll.u32 %s2020_s16, 11 }
  0x77   : > { %1062 = vmatpush1.bf16.msra.mxu0 %v1690_v34  ;;  %1168 = vmatpush1.bf16.msra.mxu1 %v1691_v35  ;;  %v1838_v34 = vld [vmem:[%s2148_s11 + $0xc] ss:$16 sps:$4 sm:$0xff]   ;;  %v1779_v35 = vld [vmem:[#allocation5 + $0x2e0] ss:$16 sps:$4 sm:$0xff]   ;;  %s2170_s9 = scalar_lea.vmem [#allocation7], %s1398_s8  ;;  %s2187_s5 = scalar_lea.hbm %s2242_s3, %s1544_s4 }
  0x78   : > { %1063 = vmatprep.subr.bf16.mxu0 %v1692_v36  ;;  %1169 = vmatprep.subr.bf16.mxu1 %v1694_v37  ;;  %v1782_v36 = vld [vmem:[#allocation5 + $0x2e8] ss:$16 sps:$4 sm:$0xff]   ;;  %v1787_v37 = vld [vmem:[#allocation5 + $0x304] ss:$16 sps:$4 sm:$0xff]   ;;  %s1304_s25 = sshll.u32 %s2170_s9, 4  ;;  %s1290_s27 = scalar_lea.sflag [#allocation4], %s2144_s6  ;;  %s2189_s25 = int_to_ptr.vmem [resolvable:$true] %s1304_s25 }
  0x79   : > { %s1900_s28 = scalar_lea.vmem %s2189_s25, 2048  ;;  %s1976_s23 = smov [#allocation7]  }
  0x7a   : > { %p1901_p4 = scmp.ne.s32.totalorder %s2189_s25, %s1900_s28  ;;  %s1904_s29 = sshll.u32 %s1976_s23, 4  ;;  %s1905_s29 = int_to_ptr.vmem [resolvable:$false] %s1904_s29 }
  0x7b   : > { %1064 = vmatpush1.bf16.msra.mxu0 %v1696_v38  ;;  %1170 = vmatpush1.bf16.msra.mxu1 %v1697_v39  ;;  %v1790_v38 = vld [vmem:[#allocation5 + $0x30c] ss:$16 sps:$4 sm:$0xff]   ;;  %v1785_v39 = vld [vmem:[#allocation5 + $0x300] ss:$16 sps:$4 sm:$0xff]   ;;  %s1906_s30 = scalar_lea.vmem %s1905_s29, 4096  ;;  %p1907_p10 = scmp.lt.s32.totalorder %s2189_s25, %s1905_s29 }
  0x7c   : > { %1065 = vmatprep.subr.bf16.mxu0 %v1698_v40  ;;  %1171 = vmatprep.subr.bf16.mxu1 %v1700_v41  ;;  %v1788_v40 = vld [vmem:[#allocation5 + $0x308] ss:$16 sps:$4 sm:$0xff]   ;;  %v1793_v41 = vld [vmem:[#allocation5 + $0x324] ss:$16 sps:$4 sm:$0xff]   ;;  %p1902_p6 = pnand %p1901_p4, %p2093_p12  ;;  %p1908_p13 = scmp.lt.s32.totalorder %s1906_s30, %s1900_s28 }
  0x7e   : > { %p1903_p8 = pneg %p1902_p6  ;;  %p1909_p3 = por %p1908_p13, %p1907_p10 }
  0x7f   : > { %1066 = vmatpush1.bf16.msra.mxu0 %v1702_v42  ;;  %1172 = vmatpush1.bf16.msra.mxu1 %v1703_v43  ;;  %v1796_v42 = vld [vmem:[#allocation5 + $0x32c] ss:$16 sps:$4 sm:$0xff]   ;;  %v1791_v43 = vld [vmem:[#allocation5 + $0x320] ss:$16 sps:$4 sm:$0xff]  }
  0x80   : > { %1067 = vmatprep.subr.bf16.mxu0 %v1704_v44  ;;  %1173 = vmatprep.subr.bf16.mxu1 %v1706_v45  ;;  %v1794_v44 = vld [vmem:[#allocation5 + $0x328] ss:$16 sps:$4 sm:$0xff]   ;;  %v1799_v45 = vld [vmem:[#allocation5 + $0x344] ss:$16 sps:$4 sm:$0xff]   ;;  %p1910_p7 = pnand %p1909_p3, %p1903_p8 }
  0x83   : > { %1068 = vmatpush1.bf16.msra.mxu0 %v1708_v46  ;;  %1174 = vmatpush1.bf16.msra.mxu1 %v1709_v47  ;;  %v1802_v46 = vld [vmem:[#allocation5 + $0x34c] ss:$16 sps:$4 sm:$0xff]   ;;  %v1797_v47 = vld [vmem:[#allocation5 + $0x340] ss:$16 sps:$4 sm:$0xff]  }
  0x84   : > { %1069 = vmatprep.subr.bf16.mxu0 %v1710_v49  ;;  %1175 = vmatprep.subr.bf16.mxu1 %v1712_v50  ;;  %v1805_v49 = vld [vmem:[#allocation5 + $0x364] ss:$16 sps:$4 sm:$0xff]   ;;  %v1808_v50 = vld [vmem:[#allocation5 + $0x36c] ss:$16 sps:$4 sm:$0xff]  }
  0x87   : > { %1070 = vmatpush1.bf16.msra.mxu0 %v1714_v51  ;;  %1176 = vmatpush1.bf16.msra.mxu1 %v1715_v52  ;;  %v1803_v51 = vld [vmem:[#allocation5 + $0x360] ss:$16 sps:$4 sm:$0xff]   ;;  %v1806_v52 = vld [vmem:[#allocation5 + $0x368] ss:$16 sps:$4 sm:$0xff]  }
  0x88   : > { %1071 = vmatprep.subr.bf16.mxu0 %v1716_v53  ;;  %1177 = vmatprep.subr.bf16.mxu1 %v1718_v54  ;;  %v1811_v53 = vld [vmem:[#allocation5 + $0x384] ss:$16 sps:$4 sm:$0xff]   ;;  %v1814_v54 = vld [vmem:[#allocation5 + $0x38c] ss:$16 sps:$4 sm:$0xff]  }
  0x8b   : > { %1072 = vmatpush1.bf16.msra.mxu0 %v1720_v55  ;;  %1178 = vmatpush1.bf16.msra.mxu1 %v1721_v56  ;;  %v1809_v55 = vld [vmem:[#allocation5 + $0x380] ss:$16 sps:$4 sm:$0xff]   ;;  %v1812_v56 = vld [vmem:[#allocation5 + $0x388] ss:$16 sps:$4 sm:$0xff]  }
  0x8c   : > { %1073 = vmatprep.subr.bf16.mxu0 %v1722_v57  ;;  %1179 = vmatprep.subr.bf16.mxu1 %v1724_v58  ;;  %v1817_v57 = vld [vmem:[#allocation5 + $0x3a4] ss:$16 sps:$4 sm:$0xff]   ;;  %v1820_v58 = vld [vmem:[#allocation5 + $0x3ac] ss:$16 sps:$4 sm:$0xff]  }
  0x8f   : > { %1074 = vmatpush1.bf16.msra.mxu0 %v1726_v59  ;;  %1180 = vmatpush1.bf16.msra.mxu1 %v1727_v60  ;;  %v1815_v59 = vld [vmem:[#allocation5 + $0x3a0] ss:$16 sps:$4 sm:$0xff]   ;;  %v1818_v60 = vld [vmem:[#allocation5 + $0x3a8] ss:$16 sps:$4 sm:$0xff]  }
  0x90   : > { %1075 = vmatprep.subr.bf16.mxu0 %v1728_v61  ;;  %1181 = vmatprep.subr.bf16.mxu1 %v1730_v62  ;;  %v1826_v61 = vld [vmem:[#allocation5 + $0x3c4] ss:$16 sps:$4 sm:$0xff]   ;;  %v1829_v62 = vld [vmem:[#allocation5 + $0x3cc] ss:$16 sps:$4 sm:$0xff]  }
  0x93   : > { %1076 = vmatpush1.bf16.msra.mxu0 %v1732_v63  ;;  %1182 = vmatpush1.bf16.msra.mxu1 %v1733_v0  ;;  %v1824_v63 = vld [vmem:[#allocation5 + $0x3c0] ss:$16 sps:$4 sm:$0xff]   ;;  %v1827_v0 = vld [vmem:[#allocation5 + $0x3c8] ss:$16 sps:$4 sm:$0xff]  }
  0x94   : > { %1098 = vmatprep.subr.bf16.mxu0 %v1739_v1  ;;  %1204 = vmatprep.subr.bf16.mxu1 %v1742_v2  ;;  %v1832_v1 = vld [vmem:[#allocation5 + $0x3e4] ss:$16 sps:$4 sm:$0xff]   ;;  %v1835_v2 = vld [vmem:[#allocation5 + $0x3ec] ss:$16 sps:$4 sm:$0xff]  }
  0x96   : > { %1078 = vmatmul.mubr.bf16.vlgmr.msra.gmra.mrb[0].mxu0 %v1734_v3  ;;  %1184 = vmatmul.mubr.bf16.vlgmr.msra.gmra.mrb[0].mxu1 %v1734_v3  ;;  %v1830_v3 = vld [vmem:[#allocation5 + $0x3e0] ss:$16 sps:$4 sm:$0xff]  }
  0x97   : > { %1099 = vmatpush1.bf16.msra.mxu0 %v1737_v4  ;;  %1205 = vmatpush1.bf16.msra.mxu1 %v1740_v5  ;;  %v1833_v4 = vld [vmem:[#allocation5 + $0x3e8] ss:$16 sps:$4 sm:$0xff]  }
  0x98   : > { %1100 = vmatprep.subr.bf16.mxu0 %v1745_v6  ;;  %1206 = vmatprep.subr.bf16.mxu1 %v1748_v7  ;;  %v1836_v5 = vld [vmem:[%s2148_s11 + $0x8] ss:$16 sps:$4 sm:$0xff]   ;;  %v1839_v6 = vld [vmem:[%s2148_s11 + $0x2c] ss:$16 sps:$4 sm:$0xff]  }
  0x99   : > { %1087 = vmatprep.mubr.bf16.mxu0 %v1821_v25  ;;  %1193 = vmatprep.mubr.bf16.mxu1 %v1821_v25  ;;  %v1841_v7 = vld [vmem:[%s2148_s11 + $0x28] ss:$16 sps:$4 sm:$0xff]  }
  0x9b   : > { %1101 = vmatpush1.bf16.msra.mxu0 %v1743_v8  ;;  %1207 = vmatpush1.bf16.msra.mxu1 %v1746_v9  ;;  %v345_v8 = vlaneseq }
  0x9c   : > { %1102 = vmatprep.subr.bf16.mxu0 %v1751_v10  ;;  %1208 = vmatprep.subr.bf16.mxu1 %v1754_v11 }
  0x9d   : > { %v346_v9 = vshrl.u32 %v345_v8, 7 }
  0x9e   : > { %1088 = vmatmul.mubr.bf16.gmra.mrb[4].mxu0 %v1823_v27  ;;  %1194 = vmatmul.mubr.bf16.gmra.mrb[4].mxu1 %v1823_v27 }
  0x9f   : > { %1103 = vmatpush1.bf16.msra.mxu0 %v1749_v12  ;;  %1209 = vmatpush1.bf16.msra.mxu1 %v1752_v13  ;;  %v347_v10 = vsub.s32 0, %v346_v9  ;;  %v355_v11 = vsub.s32 2, %v346_v9  ;;  %v343_v12 = vld [vmem:[%s2241_s2] sm:$0xf]  ;;  %v351_v13 = vsub.s32 1, %v346_v9 }
  0xa0   : > { %1104 = vmatprep.subr.bf16.mxu0 %v1757_v14  ;;  %1210 = vmatprep.subr.bf16.mxu1 %v1760_v15  ;;  %v359_v14 = vsub.s32 3, %v346_v9 }
  0xa1   : > { %1130 = vmatprep.mubr.bf16.mxu0 %v1838_v34  ;;  %1236 = vmatprep.mubr.bf16.mxu1 %v1838_v34  ;;  %v348_v15 = vrot.slane %v343_v12, %v347_v10 }
  0xa3   : > { %1105 = vmatpush1.bf16.msra.mxu0 %v1755_v16  ;;  %1211 = vmatpush1.bf16.msra.mxu1 %v1758_v17  ;;  %v356_v16 = vrot.slane %v343_v12, %v355_v11  ;;  %v352_v17 = vrot.slane %v343_v12, %v351_v13 }
  0xa4   : > { %1106 = vmatprep.subr.bf16.mxu0 %v1763_v18  ;;  %1212 = vmatprep.subr.bf16.mxu1 %v1766_v19  ;;  %v360_v18 = vrot.slane %v343_v12, %v359_v14 }
  0xa7   : > { %1107 = vmatpush1.bf16.msra.mxu0 %v1761_v20  ;;  %1213 = vmatpush1.bf16.msra.mxu1 %v1764_v21 }
  0xa8   : > { %1108 = vmatprep.subr.bf16.mxu0 %v1769_v22  ;;  %1214 = vmatprep.subr.bf16.mxu1 %v1772_v23 }
  0xab   : > { %1109 = vmatpush1.bf16.msra.mxu0 %v1767_v24  ;;  %1215 = vmatpush1.bf16.msra.mxu1 %v1770_v26 }
  0xac   : > { %1110 = vmatprep.subr.bf16.mxu0 %v1775_v28  ;;  %1216 = vmatprep.subr.bf16.mxu1 %v1778_v29 }
  0xaf   : > { %1111 = vmatpush1.bf16.msra.mxu0 %v1773_v30  ;;  %1217 = vmatpush1.bf16.msra.mxu1 %v1776_v31 }
  0xb0   : > { %1112 = vmatprep.subr.bf16.mxu0 %v1781_v32  ;;  %1218 = vmatprep.subr.bf16.mxu1 %v1784_v33 }
  0xb3   : > { %1113 = vmatpush1.bf16.msra.mxu0 %v1779_v35  ;;  %1219 = vmatpush1.bf16.msra.mxu1 %v1782_v36 }
  0xb4   : > { %1114 = vmatprep.subr.bf16.mxu0 %v1787_v37  ;;  %1220 = vmatprep.subr.bf16.mxu1 %v1790_v38 }
  0xb7   : > { %1115 = vmatpush1.bf16.msra.mxu0 %v1785_v39  ;;  %1221 = vmatpush1.bf16.msra.mxu1 %v1788_v40 }
  0xb8   : > { %1116 = vmatprep.subr.bf16.mxu0 %v1793_v41  ;;  %1222 = vmatprep.subr.bf16.mxu1 %v1796_v42 }
  0xbb   : > { %1117 = vmatpush1.bf16.msra.mxu0 %v1791_v43  ;;  %1223 = vmatpush1.bf16.msra.mxu1 %v1794_v44 }
  0xbc   : > { %1118 = vmatprep.subr.bf16.mxu0 %v1799_v45  ;;  %1224 = vmatprep.subr.bf16.mxu1 %v1802_v46 }
  0xbf   : > { %1119 = vmatpush1.bf16.msra.mxu0 %v1797_v47  ;;  %1225 = vmatpush1.bf16.msra.mxu1 %v1800_v48 }
  0xc0   : > { %1120 = vmatprep.subr.bf16.mxu0 %v1805_v49  ;;  %1226 = vmatprep.subr.bf16.mxu1 %v1808_v50 }
  0xc3   : > { %1121 = vmatpush1.bf16.msra.mxu0 %v1803_v51  ;;  %1227 = vmatpush1.bf16.msra.mxu1 %v1806_v52 }
  0xc4   : > { %1122 = vmatprep.subr.bf16.mxu0 %v1811_v53  ;;  %1228 = vmatprep.subr.bf16.mxu1 %v1814_v54 }
  0xc7   : > { %1123 = vmatpush1.bf16.msra.mxu0 %v1809_v55  ;;  %1229 = vmatpush1.bf16.msra.mxu1 %v1812_v56 }
  0xc8   : > { %1124 = vmatprep.subr.bf16.mxu0 %v1817_v57  ;;  %1230 = vmatprep.subr.bf16.mxu1 %v1820_v58 }
  0xcb   : > { %1125 = vmatpush1.bf16.msra.mxu0 %v1815_v59  ;;  %1231 = vmatpush1.bf16.msra.mxu1 %v1818_v60 }
  0xcc   : > { %1126 = vmatprep.subr.bf16.mxu0 %v1826_v61  ;;  %1232 = vmatprep.subr.bf16.mxu1 %v1829_v62 }
  0xcf   : > { %1127 = vmatpush1.bf16.msra.mxu0 %v1824_v63  ;;  %1233 = vmatpush1.bf16.msra.mxu1 %v1827_v0 }
  0xd0   : > { %1128 = vmatprep.subr.bf16.mxu0 %v1832_v1  ;;  %1234 = vmatprep.subr.bf16.mxu1 %v1835_v2 }
  0xd3   : > { %1129 = vmatpush1.bf16.msra.mxu0 %v1830_v3  ;;  %1235 = vmatpush1.bf16.msra.mxu1 %v1833_v4 }
  0xd6   : > { %1131 = vmatmul.mubr.bf16.vlgmr.msra.gmra.mrb[0].mxu0 %v1836_v5  ;;  %1237 = vmatmul.mubr.bf16.vlgmr.msra.gmra.mrb[0].mxu1 %v1836_v5 }
  0xd7   : > { %1140 = vmatprep.mubr.bf16.mxu0 %v1839_v6  ;;  %1246 = vmatprep.mubr.bf16.mxu1 %v1839_v6 }
  0xde   : > { %1141 = vmatmul.mubr.bf16.gmra.mrb[4].mxu0 %v1841_v7  ;;  %1247 = vmatmul.mubr.bf16.gmra.mrb[4].mxu1 %v1841_v7 }
 0x1a9   : > { %v1132_v19 = vpop.f32.mrb[0].mxu0  ;;  %v1238_v20 = vpop.f32.mrb[0].mxu1 }
 0x1aa   : > { %v1545_v21 = vadd.f32 %v1132_v19, %v348_v15  ;;  %v1553_v22 = vadd.f32 %v1238_v20, %v356_v16  ;;  %v1134_v23 = vpop.f32.mrb[1].mxu0  ;;  %v1240_v24 = vpop.f32.mrb[1].mxu1 }
 0x1ab   : > { %v1546_v25 = vadd.f32 %v1134_v23, %v352_v17  ;;  %v1554_v26 = vadd.f32 %v1240_v24, %v360_v18  ;;  %v1136_v27 = vpop.f32.mrb[2].mxu0  ;;  %v1242_v28 = vpop.f32.mrb[2].mxu1 }
 0x1ac   : > { %v1257_v29 = vmax.f32 %v1545_v21, 0.0  ;;  %v1259_v30 = vmax.f32 %v1553_v22, 0.0  ;;  %v1547_v31 = vadd.f32 %v1136_v27, %v348_v15  ;;  %v1555_v32 = vadd.f32 %v1242_v28, %v356_v16  ;;  %v1138_v33 = vpop.f32.mrb[3].mxu0  ;;  %v1244_v34 = vpop.f32.mrb[3].mxu1 }
 0x1ad   : > { %v1258_v35 = vmax.f32 %v1546_v25, 0.0  ;;  %v1260_v36 = vmax.f32 %v1554_v26, 0.0  ;;  %v1548_v37 = vadd.f32 %v1138_v33, %v352_v17  ;;  %v1556_v38 = vadd.f32 %v1244_v34, %v360_v18 }
 0x1ae   : > { %1273 = vst [vmem:[%s2170_s9] sm:$0xff] %v1257_v29  ;;  %1275 = vst [vmem:[%s2170_s9 + $0x10] sm:$0xff] %v1259_v30  ;;  %v1261_v39 = vmax.f32 %v1547_v31, 0.0  ;;  %v1263_v40 = vmax.f32 %v1555_v32, 0.0 }
 0x1af   : > { %1274 = vst [vmem:[%s2170_s9 + $0x8] sm:$0xff] %v1258_v35  ;;  %1276 = vst [vmem:[%s2170_s9 + $0x18] sm:$0xff] %v1260_v36  ;;  %v1262_v41 = vmax.f32 %v1548_v37, 0.0  ;;  %v1264_v42 = vmax.f32 %v1556_v38, 0.0 }
 0x1b0   : > { %1277 = vst [vmem:[%s2170_s9 + $0x20] sm:$0xff] %v1261_v39  ;;  %1279 = vst [vmem:[%s2170_s9 + $0x30] sm:$0xff] %v1263_v40 }
 0x1b1   : > { %1278 = vst [vmem:[%s2170_s9 + $0x28] sm:$0xff] %v1262_v41  ;;  %1280 = vst [vmem:[%s2170_s9 + $0x38] sm:$0xff] %v1264_v42  ;;  %v1142_v43 = vpop.f32.mrb[4].mxu0  ;;  %v1248_v44 = vpop.f32.mrb[4].mxu1 }
 0x1b2   : > { %v1549_v45 = vadd.f32 %v1142_v43, %v348_v15  ;;  %v1557_v46 = vadd.f32 %v1248_v44, %v356_v16  ;;  %v1144_v47 = vpop.f32.mrb[5].mxu0  ;;  %v1250_v48 = vpop.f32.mrb[5].mxu1 }
 0x1b3   : > { %v1550_v49 = vadd.f32 %v1144_v47, %v352_v17  ;;  %v1558_v50 = vadd.f32 %v1250_v48, %v360_v18  ;;  %v1146_v51 = vpop.f32.mrb[6].mxu0  ;;  %v1252_v52 = vpop.f32.mrb[6].mxu1 }
 0x1b4   : > { %v1265_v53 = vmax.f32 %v1549_v45, 0.0  ;;  %v1267_v54 = vmax.f32 %v1557_v46, 0.0  ;;  %v1551_v55 = vadd.f32 %v1146_v51, %v348_v15  ;;  %v1559_v56 = vadd.f32 %v1252_v52, %v356_v16  ;;  %v1148_v57 = vpop.f32.mrb[7].mxu0  ;;  %v1254_v58 = vpop.f32.mrb[7].mxu1 }
 0x1b5   : > { %v1266_v59 = vmax.f32 %v1550_v49, 0.0  ;;  %v1268_v60 = vmax.f32 %v1558_v50, 0.0  ;;  %v1552_v61 = vadd.f32 %v1148_v57, %v352_v17  ;;  %v1560_v62 = vadd.f32 %v1254_v58, %v360_v18 }
 0x1b6   : > { %1281 = vst [vmem:[%s2170_s9 + $0x40] sm:$0xff] %v1265_v53  ;;  %1283 = vst [vmem:[%s2170_s9 + $0x50] sm:$0xff] %v1267_v54  ;;  %v1269_v63 = vmax.f32 %v1551_v55, 0.0  ;;  %v1271_v0 = vmax.f32 %v1559_v56, 0.0 }
 0x1b7   : > { %1282 = vst [vmem:[%s2170_s9 + $0x48] sm:$0xff] %v1266_v59  ;;  %1284 = vst [vmem:[%s2170_s9 + $0x58] sm:$0xff] %v1268_v60  ;;  %v1270_v1 = vmax.f32 %v1552_v61, 0.0  ;;  %v1272_v2 = vmax.f32 %v1560_v62, 0.0 }
 0x1b8   : > { %1285 = vst [vmem:[%s2170_s9 + $0x60] sm:$0xff] %v1269_v63  ;;  %1287 = vst [vmem:[%s2170_s9 + $0x70] sm:$0xff] %v1271_v0 }
 0x1b9   : > { %1286 = vst [vmem:[%s2170_s9 + $0x68] sm:$0xff] %v1270_v1  ;;  %1288 = vst [vmem:[%s2170_s9 + $0x78] sm:$0xff] %v1272_v2 }
 0x1ba   : > { %1913 = shalt.err (!%p1910_p7)
}
 0x1bb   : > { %s1914_s22 = scalar_lea.hbm %s2187_s5, 2048  ;;  %s1918_s11 = scalar_lea.hbm %s2242_s3, 4096 }
 0x1bc   : > { %p1915_p9 = scmp.ne.s32.totalorder %s2187_s5, %s1914_s22  ;;  %p1919_p5 = scmp.lt.u32.totalorder %s2187_s5, %s2242_s3 }
 0x1bd   : > { %p1920_p11 = scmp.lt.u32.totalorder %s1918_s11, %s1914_s22  ;;  %p1922_p4 = scmp.lt.u32.totalorder %s1914_s22, %s2187_s5 }
 0x1be   : > { %p1916_p1 = pnand %p1915_p9, %p2093_p12 }
 0x1bf   : > { %p1921_p2 = por %p1920_p11, %p1919_p5 }
 0x1c0   : > { %p1917_p0 = pneg %p1916_p1 }
 0x1c1   : > { %p1923_p6 = por %p1922_p4, %p1921_p2 }
 0x1c3   : > { %p1924_p8 = pnand %p1923_p6, %p1917_p0 }
 0x1c5   : > { %1927 = shalt.err (!%p1924_p8)
}
 0x1c6   : > { %s1977_s8 = smov 512   ;;  %s1978_s9 = smov 32  }
 0x1c7   : > { %1583 = dma.vmem_to_hbm [thread:$0]  (%p2093_p12), %s2189_s25, 2048, %s2187_s5, %s1290_s27, %s1977_s8, %s1977_s8, %s1978_s9  }
 0x1c8 PF: > { %s1319_s4 = sand.u32 1, %s1958_s12   ;;  %p2257_p10 = scmp.ne.s32.totalorder %s2247_s19, 0 }
 0x1c9   : > { %p2258_p13 = scmp.ge.s32.totalorder %s1970_s15, 2  ;;  %s1320_s16 = scalar_lea.sflag [#allocation4], %s1319_s4 }
 0x1cb   : > { %p1594_p3 = pnand %p2258_p13, %p2257_p10 }
 0x1cd   : > { %1953 = dma.done.wait (!%p1594_p3), %s1320_s16, 2048  }
 0x1ce   : > { %1955 = vsyncadd (!%p1594_p3), %s1320_s16, 4294965248  ;;  %p17_p7 = scmp.ge.s32.totalorder %s2055_s24, 4   ;;  %s2259_s12 = smov %s1962_s13 }
 0x1cf   : > { %s2260_s13 = smov %s1966_s14  ;;  %s2261_s14 = smov %s2089_s17 }
 0x1d0   : > { %s2262_s15 = smov %s2055_s24  ;;  %19 = sbr.rel (!%p17_p7) target bundleno = 6 (0x6), region = 81 }
 0x1d7   :  { %1325 = vsyncpa [#allocation3], 1 }
 0x1d8   :  { %1327 = vsyncpa [#allocation3 + $0x1], 1 }
 0x1d9   :  { %1328 = vsyncpa [#allocation6], 1 }
 0x1da   :  { %1329 = vsyncpa [#allocation4], 1 }
 0x1db   :  { %1331 = vsyncpa [#allocation4 + $0x1], 1 }

</bundles_post_ra>
